<compile_context>
chip_gen: v7x
topology: tpu7x:2x2x1
jax: 0.10.0
libtpu: 0.0.40
codegen_flags: <defaults>
</compile_context>

<pallas_src>
import jax
import jax.numpy as jnp
from jax.experimental import pallas as pl
from jax.experimental.pallas import tpu as pltpu

LN_EPS = 1e-5  # nn.LayerNorm default


def patch_embed_kernel(x_ref, w_ref, b_ref, g_ref, beta_ref, o_ref):
    # x_ref:    (1, K, TM)  transposed im2col patches (K = C*p*p, tokens on lanes)
    # w_ref:    (E, K)      conv weight flattened, (c, i, j) order
    # b_ref:    (E, 1)      conv bias
    # g_ref:    (E, 1)      LayerNorm gamma
    # beta_ref: (E, 1)      LayerNorm beta
    # o_ref:    (1, E, TM)  normalized embeddings, channel-major layout
    xt = x_ref[0]                                                     # (K, TM)
    y = jnp.dot(w_ref[...], xt, preferred_element_type=jnp.float32)   # (E, TM) f32 acc
    y = y + b_ref[...]                                                # bias, bcast over tokens

    # LayerNorm over the embedding axis (axis 0), per token column.
    mean = jnp.mean(y, axis=0, keepdims=True)                         # (1, TM)
    var = jnp.mean((y - mean) ** 2, axis=0, keepdims=True)            # biased, like torch LN
    normed = (y - mean) * jax.lax.rsqrt(var + LN_EPS)

    o_ref[0] = (normed * g_ref[...] + beta_ref[...]).astype(o_ref.dtype)


def patch_embed(x, w_proj, b_proj, gamma, beta, patch_size, *, tm=512, compute_dtype=None):
    """x: (B, C, H, W); w_proj: (E, C, p, p) conv weight. Returns (B, E, H//p, W//p)."""
    B, C, H, W = x.shape
    p = patch_size
    assert H % p == 0 and W % p == 0, "spatial dims must be divisible by patch_size"
    Ho, Wo = H // p, W // p
    L = Ho * Wo                       # tokens per image
    E = w_proj.shape[0]
    K = C * p * p

    # im2col for non-overlapping patches, transposed so tokens land on the lane
    # axis of the kernel output (fuses away the module's output permute).
    # TODO(synk): this input-side reshuffle is still one XLA layout pass; fully
    # fusing it would need in-kernel (C, p, p) sub-tile transposes of NCHW blocks.
    xp = x.reshape(B, C, Ho, p, Wo, p)
    xp = jnp.transpose(xp, (0, 1, 3, 5, 2, 4)).reshape(B, K, L)   # (B, K, L), K=(c,i,j)

    w_mat = w_proj.reshape(E, K)                                   # matches K ordering
    b2 = b_proj.reshape(E, 1)
    g2 = gamma.reshape(E, 1)
    be2 = beta.reshape(E, 1)

    if compute_dtype is not None:                                  # bf16 path for v6e/v7x
        xp = xp.astype(compute_dtype)
        w_mat = w_mat.astype(compute_dtype)

    # Token tile on the lane axis: either the full row or a multiple of 128
    # (keeps stores lane-dense and satisfies the (8, 128) block constraint).
    if L <= tm:
        tm_eff, L_pad = L, L
    else:
        tm_eff = max(128, (min(tm, L) // 128) * 128)
        L_pad = ((L + tm_eff - 1) // tm_eff) * tm_eff
        if L_pad != L:
            xp = jnp.pad(xp, ((0, 0), (0, 0), (0, L_pad - L)))

    grid = (B, L_pad // tm_eff)
    in_elem = jnp.dtype(xp.dtype).itemsize
    out_elem = jnp.dtype(x.dtype).itemsize

    # Explicit VMEM budget: double-buffered input/output tiles + weights/params,
    # plus generous headroom for compiler scratch; capped at 64 MiB (v7x per-TC).
    need = (2 * K * tm_eff * in_elem          # input tile, double-buffered
            + 2 * E * tm_eff * out_elem       # output tile, double-buffered
            + 2 * E * K * in_elem             # weight (resident, budget x2)
            + 8 * E * 4                       # bias / gamma / beta
            + E * tm_eff * 4)                 # in-kernel f32 intermediate
    vmem_limit = int(min(64 * 1024 * 1024, max(2 * need, 16 * 1024 * 1024)))

    y = pl.pallas_call(
        patch_embed_kernel,
        out_shape=jax.ShapeDtypeStruct((B, E, L_pad), x.dtype),
        grid_spec=pltpu.PrefetchScalarGridSpec(
            num_scalar_prefetch=0,
            grid=grid,
            in_specs=[
                pl.BlockSpec((1, K, tm_eff), lambda b, i: (b, 0, i)),
                pl.BlockSpec((E, K), lambda b, i: (0, 0)),
                pl.BlockSpec((E, 1), lambda b, i: (0, 0)),
                pl.BlockSpec((E, 1), lambda b, i: (0, 0)),
                pl.BlockSpec((E, 1), lambda b, i: (0, 0)),
            ],
            out_specs=pl.BlockSpec((1, E, tm_eff), lambda b, i: (b, 0, i)),
        ),
        compiler_params=pltpu.CompilerParams(
            dimension_semantics=("parallel", "parallel"),
            vmem_limit_bytes=vmem_limit,
        ),
    )(xp, w_mat, b2, g2, be2)

    if L_pad != L:
        y = y[:, :, :L]
    # Contiguous reshape only — no extra transpose pass.
    return y.reshape(B, E, Ho, Wo)


def patch_embed_ref(x, w_proj, b_proj, gamma, beta, patch_size):
    """Pure-JAX reference mirroring the PyTorch forward exactly."""
    B, C, H, W = x.shape
    p = patch_size
    E = w_proj.shape[0]
    Ho, Wo = H // p, W // p
    # Conv2d with kernel==stride==p (VALID) == per-patch matmul.
    xp = x.reshape(B, C, Ho, p, Wo, p)
    xp = jnp.transpose(xp, (0, 2, 4, 1, 3, 5)).reshape(B, Ho * Wo, C * p * p)
    y = xp @ w_proj.reshape(E, -1).T + b_proj                      # (B, L, E)
    mean = jnp.mean(y, axis=-1, keepdims=True)
    var = jnp.mean((y - mean) ** 2, axis=-1, keepdims=True)
    y = (y - mean) * jax.lax.rsqrt(var + LN_EPS) * gamma + beta
    y = y.reshape(B, Ho, Wo, E)
    return jnp.transpose(y, (0, 3, 1, 2))


if __name__ == "__main__":
    key = jax.random.PRNGKey(0)
    B, C, H, W = 2, 16, 64, 64        # in_chans=16 (module default), small image
    p = 4                             # patch_size=4 (module default)
    E = 96                            # embed_dim=96 (module default)
    k1, k2, k3, k4, k5 = jax.random.split(key, 5)

    x = jax.random.normal(k1, (B, C, H, W), dtype=jnp.float32)
    fan_in = C * p * p
    # nn.Conv2d(C, E, kernel_size=p, stride=p): weight (E, C, p, p), bias (E,)
    w_proj = jax.random.normal(k2, (E, C, p, p), dtype=jnp.float32) / jnp.sqrt(fan_in)
    b_proj = 0.1 * jax.random.normal(k3, (E,), dtype=jnp.float32)
    # nn.LayerNorm(E) affine params — deterministic random init
    gamma = 1.0 + 0.1 * jax.random.normal(k4, (E,), dtype=jnp.float32)
    beta = 0.1 * jax.random.normal(k5, (E,), dtype=jnp.float32)

    ref = patch_embed_ref(x, w_proj, b_proj, gamma, beta, p)

    # Single-tile path (full token row fits in one block).
    out = jax.block_until_ready(patch_embed(x, w_proj, b_proj, gamma, beta, p))
    assert out.shape == (B, E, H // p, W // p), out.shape
    err = float(jnp.max(jnp.abs(out - ref)))
    assert jnp.allclose(out, ref, atol=2e-3, rtol=2e-3), err

    # Tiled path (token grid axis exercised with a 128-wide lane tile).
    out_t = jax.block_until_ready(patch_embed(x, w_proj, b_proj, gamma, beta, p, tm=128))
    err_t = float(jnp.max(jnp.abs(out_t - ref)))
    assert jnp.allclose(out_t, ref, atol=2e-3, rtol=2e-3), err_t

    print("KERNEL_OK")
</pallas_src>

<mosaic_0001>
module attributes {stable_mosaic.version = 11 : i64} {
  func.func @patch_embed_kernel(%arg0: i32, %arg1: i32, %arg2: memref<1x256x256xf32, #tpu.memory_space<vmem>>, %arg3: memref<96x256xf32, #tpu.memory_space<vmem>>, %arg4: memref<96x1xf32, #tpu.memory_space<vmem>>, %arg5: memref<96x1xf32, #tpu.memory_space<vmem>>, %arg6: memref<96x1xf32, #tpu.memory_space<vmem>>, %arg7: memref<1x96x256xf32, #tpu.memory_space<vmem>>) attributes {dimension_semantics = [#tpu.dimension_semantics<parallel>, #tpu.dimension_semantics<parallel>], iteration_bounds = array<i64: 2, 1>, scalar_prefetch = 0 : i64, scratch_operands = 0 : i64, tpu.core_type = #tpu.core_type<tc>, window_params = [{transform_indices = @transform_0, window_bounds = array<i64: 1, 256, 256>}, {pipeline_mode = #tpu.pipeline_mode<synchronous>, transform_indices = @transform_1, window_bounds = array<i64: 96, 256>}, {pipeline_mode = #tpu.pipeline_mode<synchronous>, transform_indices = @transform_2, window_bounds = array<i64: 96, 1>}, {pipeline_mode = #tpu.pipeline_mode<synchronous>, transform_indices = @transform_3, window_bounds = array<i64: 96, 1>}, {pipeline_mode = #tpu.pipeline_mode<synchronous>, transform_indices = @transform_4, window_bounds = array<i64: 96, 1>}, {transform_indices = @transform_5, window_bounds = array<i64: 1, 96, 256>}]} {
    %c0 = arith.constant 0 : index
    %c0_0 = arith.constant 0 : index
    %c0_1 = arith.constant 0 : index
    %0 = vector.load %arg2[%c0, %c0_0, %c0_1] : memref<1x256x256xf32, #tpu.memory_space<vmem>>, vector<1x256x256xf32>
    %1 = vector.shape_cast %0 : vector<1x256x256xf32> to vector<256x256xf32>
    %c0_2 = arith.constant 0 : index
    %c0_3 = arith.constant 0 : index
    %2 = vector.load %arg3[%c0_2, %c0_3] : memref<96x256xf32, #tpu.memory_space<vmem>>, vector<96x256xf32>
    %cst = arith.constant dense<0.000000e+00> : vector<96x256xf32>
    %3 = tpu.matmul %2, %1, %cst {dimension_numbers = #tpu.dot_dimension_numbers<[1], [0], [0], [1], [0, 0, 1, 1], [], []>} : vector<96x256xf32>, vector<256x256xf32>, vector<96x256xf32> -> vector<96x256xf32>
    %c0_4 = arith.constant 0 : index
    %c0_5 = arith.constant 0 : index
    %4 = vector.load %arg4[%c0_4, %c0_5] : memref<96x1xf32, #tpu.memory_space<vmem>>, vector<96x1xf32>
    %5 = vector.broadcast %4 : vector<96x1xf32> to vector<96x256xf32>
    %6 = arith.addf %3, %5 : vector<96x256xf32>
    %cst_6 = arith.constant dense<0.000000e+00> : vector<256xf32>
    %7 = vector.multi_reduction <add>, %6, %cst_6 [0] : vector<96x256xf32> to vector<256xf32>
    %8 = vector.shape_cast %7 : vector<256xf32> to vector<1x256xf32>
    %cst_7 = arith.constant 9.600000e+01 : f32
    %9 = vector.broadcast %cst_7 : f32 to vector<1x256xf32>
    %10 = arith.divf %8, %9 : vector<1x256xf32>
    %11 = vector.broadcast %10 : vector<1x256xf32> to vector<96x256xf32>
    %12 = arith.subf %6, %11 : vector<96x256xf32>
    %13 = arith.mulf %12, %12 : vector<96x256xf32>
    %cst_8 = arith.constant dense<0.000000e+00> : vector<256xf32>
    %14 = vector.multi_reduction <add>, %13, %cst_8 [0] : vector<96x256xf32> to vector<256xf32>
    %15 = vector.shape_cast %14 : vector<256xf32> to vector<1x256xf32>
    %cst_9 = arith.constant 9.600000e+01 : f32
    %16 = vector.broadcast %cst_9 : f32 to vector<1x256xf32>
    %17 = arith.divf %15, %16 : vector<1x256xf32>
    %18 = vector.broadcast %10 : vector<1x256xf32> to vector<96x256xf32>
    %19 = arith.subf %6, %18 : vector<96x256xf32>
    %cst_10 = arith.constant 9.99999974E-6 : f32
    %20 = vector.broadcast %cst_10 : f32 to vector<1x256xf32>
    %21 = arith.addf %17, %20 : vector<1x256xf32>
    %22 = math.rsqrt %21 : vector<1x256xf32>
    %23 = vector.broadcast %22 : vector<1x256xf32> to vector<96x256xf32>
    %24 = arith.mulf %19, %23 : vector<96x256xf32>
    %c0_11 = arith.constant 0 : index
    %c0_12 = arith.constant 0 : index
    %25 = vector.load %arg5[%c0_11, %c0_12] : memref<96x1xf32, #tpu.memory_space<vmem>>, vector<96x1xf32>
    %26 = vector.broadcast %25 : vector<96x1xf32> to vector<96x256xf32>
    %27 = arith.mulf %24, %26 : vector<96x256xf32>
    %c0_13 = arith.constant 0 : index
    %c0_14 = arith.constant 0 : index
    %28 = vector.load %arg6[%c0_13, %c0_14] : memref<96x1xf32, #tpu.memory_space<vmem>>, vector<96x1xf32>
    %29 = vector.broadcast %28 : vector<96x1xf32> to vector<96x256xf32>
    %30 = arith.addf %27, %29 : vector<96x256xf32>
    %c0_15 = arith.constant 0 : index
    %c0_16 = arith.constant 0 : index
    %c0_17 = arith.constant 0 : index
    %31 = vector.load %arg7[%c0_15, %c0_16, %c0_17] : memref<1x96x256xf32, #tpu.memory_space<vmem>>, vector<1x96x256xf32>
    %32 = vector.shape_cast %31 : vector<1x96x256xf32> to vector<96x256xf32>
    %33 = vector.shape_cast %30 : vector<96x256xf32> to vector<1x96x256xf32>
    tpu.vector_store %arg7[%c0_15, %c0_16, %c0_17], %33 {strides = array<i32>} : memref<1x96x256xf32, #tpu.memory_space<vmem>>, vector<1x96x256xf32>,
    return
  }
  func.func @transform_0(%arg0: i32, %arg1: i32) -> (i32, i32, i32) {
    %c0_i32 = arith.constant 0 : i32
    %c0_i32_0 = arith.constant 0 : i32
    return %arg0, %c0_i32, %arg1 : i32, i32, i32
  }
  func.func @transform_1(%arg0: i32, %arg1: i32) -> (i32, i32) {
    %c0_i32 = arith.constant 0 : i32
    %c0_i32_0 = arith.constant 0 : i32
    %c0_i32_1 = arith.constant 0 : i32
    return %c0_i32, %c0_i32_0 : i32, i32
  }
  func.func @transform_2(%arg0: i32, %arg1: i32) -> (i32, i32) {
    %c0_i32 = arith.constant 0 : i32
    %c0_i32_0 = arith.constant 0 : i32
    %c0_i32_1 = arith.constant 0 : i32
    return %c0_i32, %c0_i32_0 : i32, i32
  }
  func.func @transform_3(%arg0: i32, %arg1: i32) -> (i32, i32) {
    %c0_i32 = arith.constant 0 : i32
    %c0_i32_0 = arith.constant 0 : i32
    %c0_i32_1 = arith.constant 0 : i32
    return %c0_i32, %c0_i32_0 : i32, i32
  }
  func.func @transform_4(%arg0: i32, %arg1: i32) -> (i32, i32) {
    %c0_i32 = arith.constant 0 : i32
    %c0_i32_0 = arith.constant 0 : i32
    %c0_i32_1 = arith.constant 0 : i32
    return %c0_i32, %c0_i32_0 : i32, i32
  }
  func.func @transform_5(%arg0: i32, %arg1: i32) -> (i32, i32, i32) {
    %c0_i32 = arith.constant 0 : i32
    %c0_i32_0 = arith.constant 0 : i32
    return %arg0, %c0_i32, %arg1 : i32, i32, i32
  }
}

</mosaic_0001>

<bundles_post_ra>
// kernel: tpu_custom_call.1
= control target key start
LH: loop header
LB: loop body
LE: loop exit
PB: predicated region body
PF: predicated region fallthrough
CT: control target
= control target key end

     0   :  { %10 = vsyncpa [#allocation3], 0  ;;  %s2078_s0 = inlined_call_operand.hbm [shape: f32[2,256,256], index: 0, kind: input, shape index: {}]   ;;  %s2079_s1 = inlined_call_operand.vmem [shape: f32[96,256], index: 1, kind: input, shape index: {}]   ;;  %s2080_s2 = inlined_call_operand.vmem [shape: f32[96,1], index: 2, kind: input, shape index: {}]   ;;  %s2081_s3 = inlined_call_operand.vmem [shape: f32[96,1], index: 3, kind: input, shape index: {}]   ;;  %s2082_s4 = inlined_call_operand.vmem [shape: f32[96,1], index: 4, kind: input, shape index: {}]   ;;  %s2083_s5 = inlined_call_operand.hbm [shape: f32[2,96,256], index: 5, kind: output, shape index: {}]  }
   0x1   :  { %12 = vsyncpa [#allocation3 + $0x1], 0 }
   0x2   :  { %13 = vsyncpa [#allocation4], 0 }
   0x3   :  { %15 = vsyncpa [#allocation4 + $0x1], 0  ;;  %s1363_s18 = smov 0   ;;  %s1365_s19 = smov 0  }
   0x4   :  { %s1367_s20 = smov 0   ;;  %s1369_s21 = smov 0  }
   0x5   :  { %s1371_s22 = smov 0   ;;  %s1373_s23 = smov 0  }
   0x6 LB: > { %s1028_s24 = sadd.s32 4294967295, %s1324_s23   ;;  %s1029_s25 = sadd.s32 4294967294, %s1324_s23   ;;  %s1324_s23 = sphi %s1373_s23, %s21_s23   ;;  %s1320_s22 = sphi %s1371_s22, %s2098_s22   ;;  %s1316_s21 = sphi %s1369_s21, %s2097_s21   ;;  %s1312_s20 = sphi %s1367_s20, %s2096_s20   ;;  %s1308_s19 = sphi %s1365_s19, %s2095_s19   ;;  %s1304_s18 = sphi %s1363_s18, %s2094_s18  }
   0x7   : > { %s33_s26 = sadd.s32 1, %s1320_s22  ;;  %s42_s27 = sadd.s32 1, %s1312_s20 }
   0x8   : > { %p35_p0 = scmp.ge.s32.totalorder %s33_s26, 2  ;;  %p49_p1 = scmp.ne.s32.totalorder %s1312_s20, %s1308_s19 }
   0x9   : > { %p50_p2 = scmp.eq.s32.totalorder %s1324_s23, 0  ;;  %p55_p3 = scmp.ne.s32.totalorder %s1308_s19, %s1304_s18 }
   0xa   : > { %s2100_s26 = smov (%p35_p0, %s33_s26), 0  ;;  %p56_p5 = scmp.eq.s32.totalorder %s1028_s24, 0 }
   0xb   : > { %p1404_p4 = por %p50_p2, %p49_p1  ;;  %s37_s29 = ssub.s32 %s1320_s22, %s2100_s26 }
   0xc   : > { %p165_p6 = scmp.eq.s32.totalorder %s1028_s24, 1  ;;  %p40_p7 = scmp.eq.s32.totalorder %s37_s29, 0 }
   0xd   : > { %p1410_p8 = por %p56_p5, %p55_p3  ;;  %p171_p10 = scmp.eq.s32.totalorder %s1029_s25, 1 }
   0xe   : > { %p1414_p9 = por %p165_p6, %p49_p1  ;;  %p1151_p13 = scmp.lt.s32.totalorder %s1324_s23, 2 }
   0xf   : > { %s1419_s7 = scalar_select %p40_p7, %s1312_s20, %s42_s27  }
  0x10   : > { %s2087_s6 = scalar_select %p1414_p9, 1, 0 }
  0x11   : > { %p1421_p11 = por %p171_p10, %p55_p3  ;;  %s203_s9 = sand.u32 1, %s1312_s20  }
  0x12   : > { %s1032_s10 = sshll.u32 %s203_s9, 9  ;;  %s1040_s11 = sshll.u32 %s1320_s22, 13 }
  0x13   : > { %s2088_s8 = scalar_select %p1421_p11, 1, 0 }
  0x14   : > { %s1432_s14 = scalar_lea.hbm %s2078_s0, %s1040_s11  ;;  %s207_s15 = scalar_lea.vmem [#allocation2], %s1032_s10 }
  0x15   : > { %s216_s16 = sshll.u32 %s207_s15, 4  ;;  %p1438_p0 = pnand %p1151_p13, %p1404_p4  ;;  %s1434_s16 = int_to_ptr.vmem [resolvable:$true] %s216_s16 }
  0x16   : > { %s1443_s24 = scalar_lea.sflag [#allocation3], %s203_s9  ;;  %s1212_s25 = scalar_lea.hbm %s1432_s14, 8192 }
  0x17   : > { %p1213_p2 = scmp.ne.s32.totalorder %s1432_s14, %s1212_s25  ;;  %p1214_p3 = pneg %p1438_p0 }
  0x18   : > { %s1217_s28 = scalar_lea.hbm %s2078_s0, 16384  ;;  %p1218_p4 = scmp.lt.u32.totalorder %s1432_s14, %s2078_s0 }
  0x19   : > { %p1215_p5 = pnand %p1214_p3, %p1213_p2  ;;  %p1219_p7 = scmp.lt.u32.totalorder %s1217_s28, %s1212_s25 }
  0x1a   : > { %p1221_p13 = scmp.lt.u32.totalorder %s1212_s25, %s1432_s14 }
  0x1b   : > { %p1216_p6 = pneg %p1215_p5  ;;  %p1220_p10 = por %p1219_p7, %p1218_p4 }
  0x1d   : > { %p1222_p12 = por %p1221_p13, %p1220_p10 }
  0x1f   : > { %p1223_p1 = pnand %p1222_p12, %p1216_p6 }
  0x21   : > { %1226 = shalt.err (!%p1223_p1)
}
  0x22   : > { %s1227_s9 = scalar_lea.vmem %s1434_s16, 8192  ;;  %s1326_s12 = smov [#allocation2]  }
  0x23   : > { %p1228_p2 = scmp.ne.s32.totalorder %s1434_s16, %s1227_s9  ;;  %s1232_s13 = sshll.u32 %s1326_s12, 4  ;;  %s1233_s13 = int_to_ptr.vmem [resolvable:$false] %s1232_s13 }
  0x24   : > { %s1234_s15 = scalar_lea.vmem %s1233_s13, 16384  ;;  %p1235_p9 = scmp.lt.s32.totalorder %s1434_s16, %s1233_s13 }
  0x25   : > { %p1230_p5 = pnand %p1228_p2, %p1214_p3  ;;  %p1236_p4 = scmp.lt.s32.totalorder %s1234_s15, %s1227_s9 }
  0x27   : > { %p1231_p11 = pneg %p1230_p5  ;;  %p1237_p7 = por %p1236_p4, %p1235_p9 }
  0x29   : > { %p1238_p10 = pnand %p1237_p7, %p1231_p11 }
  0x2b   : > { %1241 = shalt.err (!%p1238_p10)
}
  0x2c   : > { %s1327_s25 = smov 256   ;;  %s1328_s27 = smov 16  }
  0x2d   : > { %1146 = dma.hbm_to_vmem [thread:$0]  (!%p1438_p0), %s1432_s14, 8192, %s1434_s16, %s1443_s24, %s1327_s25, %s1327_s25, %s1328_s27  }
  0x2e   : > { %p224_p12 = scmp.lt.s32.totalorder %s1324_s23, 3  ;;  %p2090_p1 = scmp.ge.s32.totalorder %s1324_s23, 1 }
  0x30   : > { %p225_p3 = pnand %p2090_p1, %p224_p12 }
  0x31   : > { %s1475_s29 = sand.u32 (!%p225_p3), 1, %s1308_s19  }
  0x32   : > { %228 = sbr.rel (%p225_p3) target bundleno = 480 (0x1e0), region = 40  ;;  %s1036_s28 = sshll.u32 (!%p225_p3), %s1475_s29, 9 }
  0x33   : > { %s231_s10 = scalar_lea.sflag (!%p225_p3), [#allocation3], %s1475_s29  ;;  %s1479_s11 = scalar_lea.vmem (!%p225_p3), [#allocation2], %s1036_s28 }
  0x39   : > { %1295 = dma.done.wait (%p1410_p8), %s231_s10, 8192  }
  0x3a   : > { %1297 = vsyncadd (%p1410_p8), %s231_s10, 4294959104  ;;  %v1329_v0 = vmov 0   ;;  %v264_v1 = vld [vmem:[%s1479_s11 + $0x8] sm:$0xff]  ;;  %v266_v2 = vld [vmem:[%s1479_s11 + $0x18] sm:$0xff]  ;;  %s1137_s27 = smul.u32 192, %s1475_s29  ;;  %p2091_p9 = scmp.ne.s32.totalorder %s2087_s6, 0 }
  0x3b   : > { %1206 = vset.pattern.permute.xlu0 %v1329_v0  ;;  %1207 = vset.pattern.permute.xlu1 %v1329_v0  ;;  %v263_v3 = vld [vmem:[%s1479_s11] sm:$0xff]  ;;  %v1041_v4 = vpack.c.bf16 %v266_v2, %v264_v1  ;;  %v265_v5 = vld [vmem:[%s1479_s11 + $0x10] sm:$0xff]  ;;  %v268_v6 = vld [vmem:[%s1479_s11 + $0x28] sm:$0xff]  ;;  %s1138_s10 = smul.u32 3072, %s1316_s21  ;;  %s1330_s24 = smov [#allocation5]  }
  0x3c   : > { %v270_v7 = vld [vmem:[%s1479_s11 + $0x38] sm:$0xff]  ;;  %v1043_v8 = vpack.c.bf16 %v265_v5, %v263_v3  ;;  %v267_v10 = vld [vmem:[%s1479_s11 + $0x20] sm:$0xff]  ;;  %v269_v11 = vld [vmem:[%s1479_s11 + $0x30] sm:$0xff]  ;;  %s1962_s28 = scalar_lea.vmem [#allocation5], %s1137_s27  ;;  %s1246_s9 = sshll.u32 %s1330_s24, 4  ;;  %s1247_s9 = int_to_ptr.vmem [resolvable:$false] %s1246_s9 }
  0x3d   : > { %v1045_v9 = vpack.c.bf16 %v270_v7, %v268_v6  ;;  %v272_v12 = vld [vmem:[%s1479_s11 + $0x48] sm:$0xff]  ;;  %1042 = vmatprep.subr.bf16.mxu0 %v1041_v4  ;;  %1105 = vmatprep.subr.bf16.mxu1 %v1041_v4  ;;  %v274_v13 = vld [vmem:[%s1479_s11 + $0x58] sm:$0xff]  ;;  %v1047_v14 = vpack.c.bf16 %v269_v11, %v267_v10  ;;  %v271_v16 = vld [vmem:[%s1479_s11 + $0x40] sm:$0xff]  ;;  %s941_s30 = sshll.u32 %s1962_s28, 4  ;;  %s2013_s16 = scalar_lea.hbm %s2083_s5, %s1138_s10  ;;  %s2015_s30 = int_to_ptr.vmem [resolvable:$true] %s941_s30 }
  0x3e   : > { %1044 = vmatpush1.bf16.msra.mxu0 %v1043_v8  ;;  %1121 = vmatpush1.bf16.msra.mxu1 %v1043_v8  ;;  %v1049_v15 = vpack.c.bf16 %v274_v13, %v272_v12  ;;  %v273_v17 = vld [vmem:[%s1479_s11 + $0x50] sm:$0xff]  ;;  %v276_v18 = vld [vmem:[%s1479_s11 + $0x68] sm:$0xff]  ;;  %v278_v19 = vld [vmem:[%s1479_s11 + $0x78] sm:$0xff]  ;;  %s1242_s17 = scalar_lea.vmem %s2015_s30, 3072  ;;  %s1248_s12 = scalar_lea.vmem %s1247_s9, 6144 }
  0x3f   : > { %1046 = vmatprep.subr.bf16.mxu0 %v1045_v9  ;;  %1106 = vmatprep.subr.bf16.mxu1 %v1045_v9  ;;  %v1051_v20 = vpack.c.bf16 %v273_v17, %v271_v16  ;;  %v1053_v21 = vpack.c.bf16 %v278_v19, %v276_v18  ;;  %v275_v22 = vld [vmem:[%s1479_s11 + $0x60] sm:$0xff]  ;;  %v277_v23 = vld [vmem:[%s1479_s11 + $0x70] sm:$0xff]  ;;  %v280_v24 = vld [vmem:[%s1479_s11 + $0x88] sm:$0xff]  ;;  %p1243_p8 = scmp.ne.s32.totalorder %s2015_s30, %s1242_s17  ;;  %p1249_p6 = scmp.lt.s32.totalorder %s2015_s30, %s1247_s9 }
  0x40   : > { %v282_v25 = vld [vmem:[%s1479_s11 + $0x98] sm:$0xff]  ;;  %v1055_v26 = vpack.c.bf16 %v277_v23, %v275_v22  ;;  %v279_v28 = vld [vmem:[%s1479_s11 + $0x80] sm:$0xff]  ;;  %v281_v29 = vld [vmem:[%s1479_s11 + $0x90] sm:$0xff]  ;;  %p1250_p13 = scmp.lt.s32.totalorder %s1248_s12, %s1242_s17 }
  0x41   : > { %v1057_v27 = vpack.c.bf16 %v282_v25, %v280_v24  ;;  %v284_v30 = vld [vmem:[%s1479_s11 + $0xa8] sm:$0xff]  ;;  %v286_v31 = vld [vmem:[%s1479_s11 + $0xb8] sm:$0xff]  ;;  %v1059_v32 = vpack.c.bf16 %v281_v29, %v279_v28  ;;  %v283_v34 = vld [vmem:[%s1479_s11 + $0xa0] sm:$0xff]  ;;  %p1244_p11 = pnand %p1243_p8, %p2091_p9 }
  0x42   : > { %1048 = vmatpush1.bf16.msra.mxu0 %v1047_v14  ;;  %1122 = vmatpush1.bf16.msra.mxu1 %v1047_v14  ;;  %v1061_v33 = vpack.c.bf16 %v286_v31, %v284_v30  ;;  %v285_v35 = vld [vmem:[%s1479_s11 + $0xb0] sm:$0xff]  ;;  %v288_v36 = vld [vmem:[%s1479_s11 + $0xc8] sm:$0xff]  ;;  %v290_v37 = vld [vmem:[%s1479_s11 + $0xd8] sm:$0xff]  ;;  %p1251_p2 = por %p1250_p13, %p1249_p6 }
  0x43   : > { %1050 = vmatprep.subr.bf16.mxu0 %v1049_v15  ;;  %1107 = vmatprep.subr.bf16.mxu1 %v1049_v15  ;;  %v1063_v38 = vpack.c.bf16 %v285_v35, %v283_v34  ;;  %v287_v39 = vld [vmem:[%s1479_s11 + $0xc0] sm:$0xff]  ;;  %v1065_v40 = vpack.c.bf16 %v290_v37, %v288_v36  ;;  %v289_v41 = vld [vmem:[%s1479_s11 + $0xd0] sm:$0xff]  ;;  %v328_v42 = vld [vmem:[%s2079_s1 + $0x8] sm:$0xff]  ;;  %p1245_p0 = pneg %p1244_p11 }
  0x44   : > { %v340_v43 = vld [vmem:[%s2079_s1 + $0x68] sm:$0xff]  ;;  %v294_v45 = vld [vmem:[%s1479_s11 + $0xf8] sm:$0xff]  ;;  %487 = vmatprep.mubr.f32.mxu0 %v328_v42  ;;  %v1067_v46 = vpack.c.bf16 %v289_v41, %v287_v39  ;;  %v291_v48 = vld [vmem:[%s1479_s11 + $0xe0] sm:$0xff] }
  0x45   : > { %v292_v44 = vld [vmem:[%s1479_s11 + $0xe8] sm:$0xff]  ;;  %523 = vmatprep.mubr.f32.mxu1 %v340_v43  ;;  %v293_v49 = vld [vmem:[%s1479_s11 + $0xf0] sm:$0xff]  ;;  %v298_v51 = vld [vmem:[%s1479_s11 + $0x118] sm:$0xff]  ;;  %p1252_p5 = pnand %p1251_p2, %p1245_p0 }
  0x46   : > { %1052 = vmatpush1.bf16.msra.mxu0 %v1051_v20  ;;  %1123 = vmatpush1.bf16.msra.mxu1 %v1051_v20  ;;  %v1069_v47 = vpack.c.bf16 %v294_v45, %v292_v44  ;;  %v296_v50 = vld [vmem:[%s1479_s11 + $0x108] sm:$0xff]  ;;  %v1071_v52 = vpack.c.bf16 %v293_v49, %v291_v48  ;;  %v295_v53 = vld [vmem:[%s1479_s11 + $0x100] sm:$0xff]  ;;  %v297_v55 = vld [vmem:[%s1479_s11 + $0x110] sm:$0xff] }
  0x47   : > { %1054 = vmatprep.subr.bf16.mxu0 %v1053_v21  ;;  %1108 = vmatprep.subr.bf16.mxu1 %v1053_v21  ;;  %v1073_v54 = vpack.c.bf16 %v298_v51, %v296_v50  ;;  %v351_v56 = vld [vmem:[%s2080_s2] sm:$0xff]  ;;  %v353_v57 = vld [vmem:[%s2080_s2 + $0x10] sm:$0xff]  ;;  %v300_v58 = vld [vmem:[%s1479_s11 + $0x128] sm:$0xff]  ;;  %v1075_v62 = vpack.c.bf16 %v297_v55, %v295_v53 }
  0x48   : > { %v302_v59 = vld [vmem:[%s1479_s11 + $0x138] sm:$0xff]  ;;  %365 = vperm.xlu0 %1206, %v351_v56   ;;  %375 = vperm.xlu1 %1207, %v353_v57   ;;  %v352_v60 = vld [vmem:[%s2080_s2 + $0x8] sm:$0xff]  ;;  %v299_v0 = vld [vmem:[%s1479_s11 + $0x120] sm:$0xff] }
  0x49   : > { %v354_v61 = vld [vmem:[%s2080_s2 + $0x18] sm:$0xff]  ;;  %v1077_v63 = vpack.c.bf16 %v302_v59, %v300_v58  ;;  %v301_v1 = vld [vmem:[%s1479_s11 + $0x130] sm:$0xff]  ;;  %v304_v2 = vld [vmem:[%s1479_s11 + $0x148] sm:$0xff] }
  0x4a   : > { %1056 = vmatpush1.bf16.msra.mxu0 %v1055_v26  ;;  %1124 = vmatpush1.bf16.msra.mxu1 %v1055_v26  ;;  %v306_v3 = vld [vmem:[%s1479_s11 + $0x158] sm:$0xff]  ;;  %v355_v4 = vld [vmem:[%s2080_s2 + $0x20] sm:$0xff]  ;;  %v356_v5 = vld [vmem:[%s2080_s2 + $0x28] sm:$0xff]  ;;  %v1079_v6 = vpack.c.bf16 %v301_v1, %v299_v0 }
  0x4b   : > { %1058 = vmatprep.subr.bf16.mxu0 %v1057_v27  ;;  %1109 = vmatprep.subr.bf16.mxu1 %v1057_v27  ;;  %v1081_v7 = vpack.c.bf16 %v306_v3, %v304_v2  ;;  %v303_v8 = vld [vmem:[%s1479_s11 + $0x140] sm:$0xff]  ;;  %v305_v9 = vld [vmem:[%s1479_s11 + $0x150] sm:$0xff]  ;;  %v308_v10 = vld [vmem:[%s1479_s11 + $0x168] sm:$0xff] }
  0x4c   : > { %370 = vperm.xlu0 %1206, %v352_v60   ;;  %380 = vperm.xlu1 %1207, %v354_v61   ;;  %v310_v11 = vld [vmem:[%s1479_s11 + $0x178] sm:$0xff]  ;;  %v357_v12 = vld [vmem:[%s2080_s2 + $0x30] sm:$0xff]  ;;  %v1083_v14 = vpack.c.bf16 %v305_v9, %v303_v8  ;;  %v307_v16 = vld [vmem:[%s1479_s11 + $0x160] sm:$0xff] }
  0x4d   : > { %v358_v13 = vld [vmem:[%s2080_s2 + $0x38] sm:$0xff]  ;;  %v1085_v15 = vpack.c.bf16 %v310_v11, %v308_v10  ;;  %v309_v17 = vld [vmem:[%s1479_s11 + $0x170] sm:$0xff]  ;;  %v312_v18 = vld [vmem:[%s1479_s11 + $0x188] sm:$0xff] }
  0x4e   : > { %1060 = vmatpush1.bf16.msra.mxu0 %v1059_v32  ;;  %1125 = vmatpush1.bf16.msra.mxu1 %v1059_v32  ;;  %v314_v19 = vld [vmem:[%s1479_s11 + $0x198] sm:$0xff]  ;;  %v359_v20 = vld [vmem:[%s2080_s2 + $0x40] sm:$0xff]  ;;  %v360_v21 = vld [vmem:[%s2080_s2 + $0x48] sm:$0xff]  ;;  %v1087_v22 = vpack.c.bf16 %v309_v17, %v307_v16 }
  0x4f   : > { %1062 = vmatprep.subr.bf16.mxu0 %v1061_v33  ;;  %1110 = vmatprep.subr.bf16.mxu1 %v1061_v33  ;;  %v1089_v23 = vpack.c.bf16 %v314_v19, %v312_v18  ;;  %v311_v24 = vld [vmem:[%s1479_s11 + $0x180] sm:$0xff]  ;;  %v313_v25 = vld [vmem:[%s1479_s11 + $0x190] sm:$0xff]  ;;  %v316_v26 = vld [vmem:[%s1479_s11 + $0x1a8] sm:$0xff] }
  0x50   : > { %385 = vperm.xlu0 %1206, %v355_v4   ;;  %390 = vperm.xlu1 %1207, %v356_v5   ;;  %v318_v27 = vld [vmem:[%s1479_s11 + $0x1b8] sm:$0xff]  ;;  %v361_v28 = vld [vmem:[%s2080_s2 + $0x50] sm:$0xff]  ;;  %v1091_v30 = vpack.c.bf16 %v313_v25, %v311_v24  ;;  %v315_v32 = vld [vmem:[%s1479_s11 + $0x1a0] sm:$0xff] }
  0x51   : > { %v362_v29 = vld [vmem:[%s2080_s2 + $0x58] sm:$0xff]  ;;  %v1093_v31 = vpack.c.bf16 %v318_v27, %v316_v26  ;;  %v317_v33 = vld [vmem:[%s1479_s11 + $0x1b0] sm:$0xff]  ;;  %v320_v34 = vld [vmem:[%s1479_s11 + $0x1c8] sm:$0xff] }
  0x52   : > { %1064 = vmatpush1.bf16.msra.mxu0 %v1063_v38  ;;  %1126 = vmatpush1.bf16.msra.mxu1 %v1063_v38  ;;  %v322_v35 = vld [vmem:[%s1479_s11 + $0x1d8] sm:$0xff]  ;;  %v709_v36 = vld [vmem:[%s2081_s3] sm:$0xff]  ;;  %v710_v37 = vld [vmem:[%s2081_s3 + $0x8] sm:$0xff]  ;;  %v1095_v38 = vpack.c.bf16 %v317_v33, %v315_v32 }
  0x53   : > { %1066 = vmatprep.subr.bf16.mxu0 %v1065_v40  ;;  %1111 = vmatprep.subr.bf16.mxu1 %v1065_v40  ;;  %v1097_v39 = vpack.c.bf16 %v322_v35, %v320_v34  ;;  %v319_v40 = vld [vmem:[%s1479_s11 + $0x1c0] sm:$0xff]  ;;  %v321_v41 = vld [vmem:[%s1479_s11 + $0x1d0] sm:$0xff]  ;;  %v324_v42 = vld [vmem:[%s1479_s11 + $0x1e8] sm:$0xff] }
  0x54   : > { %395 = vperm.xlu0 %1206, %v357_v12   ;;  %400 = vperm.xlu1 %1207, %v358_v13   ;;  %v326_v43 = vld [vmem:[%s1479_s11 + $0x1f8] sm:$0xff]  ;;  %v711_v44 = vld [vmem:[%s2081_s3 + $0x10] sm:$0xff]  ;;  %v323_v48 = vld [vmem:[%s1479_s11 + $0x1e0] sm:$0xff] }
  0x55   : > { %v712_v45 = vld [vmem:[%s2081_s3 + $0x18] sm:$0xff]  ;;  %v325_v49 = vld [vmem:[%s1479_s11 + $0x1f0] sm:$0xff]  ;;  %v713_v50 = vld [vmem:[%s2081_s3 + $0x20] sm:$0xff]  ;;  %s926_s11 = scalar_lea.sflag [#allocation4], %s1475_s29 }
  0x56   : > { %1068 = vmatpush1.bf16.msra.mxu0 %v1067_v46  ;;  %1127 = vmatpush1.bf16.msra.mxu1 %v1067_v46  ;;  %v1099_v46 = vpack.c.bf16 %v321_v41, %v319_v40  ;;  %v714_v51 = vld [vmem:[%s2081_s3 + $0x28] sm:$0xff]  ;;  %v715_v53 = vld [vmem:[%s2081_s3 + $0x30] sm:$0xff]  ;;  %v327_v55 = vld [vmem:[%s2079_s1] sm:$0xff] }
  0x57   : > { %1070 = vmatprep.subr.bf16.mxu0 %v1069_v47  ;;  %1112 = vmatprep.subr.bf16.mxu1 %v1069_v47  ;;  %v1101_v47 = vpack.c.bf16 %v326_v43, %v324_v42  ;;  %v339_v56 = vld [vmem:[%s2079_s1 + $0x60] sm:$0xff]  ;;  %v330_v57 = vld [vmem:[%s2079_s1 + $0x18] sm:$0xff]  ;;  %v718_v60 = vld [vmem:[%s2081_s3 + $0x48] sm:$0xff] }
  0x58   : > { %405 = vperm.xlu0 %1206, %v359_v20   ;;  %410 = vperm.xlu1 %1207, %v360_v21   ;;  %v342_v58 = vld [vmem:[%s2079_s1 + $0x78] sm:$0xff]  ;;  %v717_v59 = vld [vmem:[%s2081_s3 + $0x40] sm:$0xff]  ;;  %v329_v61 = vld [vmem:[%s2079_s1 + $0x10] sm:$0xff] }
  0x59   : > { %v344_v0 = vld [vmem:[%s2079_s1 + $0x88] sm:$0xff]  ;;  %v719_v1 = vld [vmem:[%s2081_s3 + $0x50] sm:$0xff]  ;;  %v720_v2 = vld [vmem:[%s2081_s3 + $0x58] sm:$0xff] }
  0x5a   : > { %1072 = vmatpush1.bf16.msra.mxu0 %v1071_v52  ;;  %1128 = vmatpush1.bf16.msra.mxu1 %v1071_v52  ;;  %v1103_v52 = vpack.c.bf16 %v325_v49, %v323_v48  ;;  %v331_v3 = vld [vmem:[%s2079_s1 + $0x20] sm:$0xff]  ;;  %v334_v5 = vld [vmem:[%s2079_s1 + $0x38] sm:$0xff]  ;;  %v806_v8 = vld [vmem:[%s2082_s4 + $0x8] sm:$0xff] }
  0x5b   : > { %1074 = vmatprep.subr.bf16.mxu0 %v1073_v54  ;;  %1113 = vmatprep.subr.bf16.mxu1 %v1073_v54  ;;  %v716_v54 = vld [vmem:[%s2081_s3 + $0x38] sm:$0xff]  ;;  %v343_v4 = vld [vmem:[%s2079_s1 + $0x80] sm:$0xff]  ;;  %v333_v9 = vld [vmem:[%s2079_s1 + $0x30] sm:$0xff] }
  0x5c   : > { %415 = vperm.xlu0 %1206, %v361_v28   ;;  %420 = vperm.xlu1 %1207, %v362_v29   ;;  %v345_v10 = vld [vmem:[%s2079_s1 + $0x90] sm:$0xff]  ;;  %v336_v11 = vld [vmem:[%s2079_s1 + $0x48] sm:$0xff]  ;;  %v347_v16 = vld [vmem:[%s2079_s1 + $0xa0] sm:$0xff] }
  0x5d   : > { %v348_v12 = vld [vmem:[%s2079_s1 + $0xa8] sm:$0xff]  ;;  %v807_v13 = vld [vmem:[%s2082_s4 + $0x10] sm:$0xff]  ;;  %v338_v17 = vld [vmem:[%s2079_s1 + $0x58] sm:$0xff] }
  0x5e   : > { %1076 = vmatpush1.bf16.msra.mxu0 %v1075_v62  ;;  %1129 = vmatpush1.bf16.msra.mxu1 %v1075_v62  ;;  %v341_v62 = vld [vmem:[%s2079_s1 + $0x70] sm:$0xff]  ;;  %v350_v18 = vld [vmem:[%s2079_s1 + $0xb8] sm:$0xff]  ;;  %v809_v19 = vld [vmem:[%s2082_s4 + $0x20] sm:$0xff] }
  0x5f   : > { %1078 = vmatprep.subr.bf16.mxu0 %v1077_v63  ;;  %1114 = vmatprep.subr.bf16.mxu1 %v1077_v63  ;;  %v332_v63 = vld [vmem:[%s2079_s1 + $0x28] sm:$0xff]  ;;  %v337_v21 = vld [vmem:[%s2079_s1 + $0x50] sm:$0xff]  ;;  %v812_v24 = vld [vmem:[%s2082_s4 + $0x38] sm:$0xff] }
  0x60   : > { %723 = vperm.xlu0 %1206, %v709_v36   ;;  %728 = vperm.xlu1 %1207, %v710_v37   ;;  %v810_v20 = vld [vmem:[%s2082_s4 + $0x28] sm:$0xff]  ;;  %v813_v25 = vld [vmem:[%s2082_s4 + $0x40] sm:$0xff]  ;;  %v815_v27 = vld [vmem:[%s2082_s4 + $0x50] sm:$0xff] }
  0x61   : > { %v814_v26 = vld [vmem:[%s2082_s4 + $0x48] sm:$0xff]  ;;  %v816_v28 = vld [vmem:[%s2082_s4 + $0x58] sm:$0xff] }
  0x62   : > { %1080 = vmatpush1.bf16.msra.mxu0 %v1079_v6  ;;  %1130 = vmatpush1.bf16.msra.mxu1 %v1079_v6  ;;  %v346_v6 = vld [vmem:[%s2079_s1 + $0x98] sm:$0xff] }
  0x63   : > { %1082 = vmatprep.subr.bf16.mxu0 %v1081_v7  ;;  %1115 = vmatprep.subr.bf16.mxu1 %v1081_v7  ;;  %v805_v7 = vld [vmem:[%s2082_s4] sm:$0xff] }
  0x64   : > { %733 = vperm.xlu0 %1206, %v711_v44   ;;  %738 = vperm.xlu1 %1207, %v712_v45  }
  0x66   : > { %1084 = vmatpush1.bf16.msra.mxu0 %v1083_v14  ;;  %1131 = vmatpush1.bf16.msra.mxu1 %v1083_v14  ;;  %v808_v14 = vld [vmem:[%s2082_s4 + $0x18] sm:$0xff] }
  0x67   : > { %1086 = vmatprep.subr.bf16.mxu0 %v1085_v15  ;;  %1116 = vmatprep.subr.bf16.mxu1 %v1085_v15  ;;  %v335_v15 = vld [vmem:[%s2079_s1 + $0x40] sm:$0xff] }
  0x68   : > { %743 = vperm.xlu0 %1206, %v713_v50   ;;  %748 = vperm.xlu1 %1207, %v714_v51  }
  0x6a   : > { %1088 = vmatpush1.bf16.msra.mxu0 %v1087_v22  ;;  %1132 = vmatpush1.bf16.msra.mxu1 %v1087_v22  ;;  %v349_v22 = vld [vmem:[%s2079_s1 + $0xb0] sm:$0xff] }
  0x6b   : > { %1090 = vmatprep.subr.bf16.mxu0 %v1089_v23  ;;  %1117 = vmatprep.subr.bf16.mxu1 %v1089_v23  ;;  %v811_v23 = vld [vmem:[%s2082_s4 + $0x30] sm:$0xff] }
  0x6c   : > { %753 = vperm.xlu0 %1206, %v715_v53   ;;  %758 = vperm.xlu1 %1207, %v716_v54  }
  0x6e   : > { %1092 = vmatpush1.bf16.msra.mxu0 %v1091_v30  ;;  %1133 = vmatpush1.bf16.msra.mxu1 %v1091_v30 }
  0x6f   : > { %1094 = vmatprep.subr.bf16.mxu0 %v1093_v31  ;;  %1118 = vmatprep.subr.bf16.mxu1 %v1093_v31 }
  0x70   : > { %763 = vperm.xlu0 %1206, %v717_v59   ;;  %768 = vperm.xlu1 %1207, %v718_v60  }
  0x72   : > { %1096 = vmatpush1.bf16.msra.mxu0 %v1095_v38  ;;  %1134 = vmatpush1.bf16.msra.mxu1 %v1095_v38 }
  0x73   : > { %1098 = vmatprep.subr.bf16.mxu0 %v1097_v39  ;;  %1119 = vmatprep.subr.bf16.mxu1 %v1097_v39 }
  0x74   : > { %773 = vperm.xlu0 %1206, %v719_v1   ;;  %778 = vperm.xlu1 %1207, %v720_v2  }
  0x76   : > { %1100 = vmatpush1.bf16.msra.mxu0 %v1099_v46  ;;  %1135 = vmatpush1.bf16.msra.mxu1 %v1099_v46 }
  0x77   : > { %1102 = vmatprep.subr.bf16.mxu0 %v1101_v47  ;;  %1120 = vmatprep.subr.bf16.mxu1 %v1101_v47 }
  0x78   : > { %819 = vperm.xlu0 %1206, %v805_v7   ;;  %824 = vperm.xlu1 %1207, %v806_v8  }
  0x7a   : > { %1104 = vmatpush1.bf16.msra.mxu0 %v1103_v52  ;;  %1136 = vmatpush1.bf16.msra.mxu1 %v1103_v52 }
  0x7c   : > { %829 = vperm.xlu0 %1206, %v807_v13   ;;  %834 = vperm.xlu1 %1207, %v808_v14  }
  0x7d   : > { %488 = vmatmul.mubr.f32.vlgmr.msra.gmra.mrb[0].mxu0 %v327_v55  ;;  %524 = vmatmul.mubr.f32.vlgmr.msra.gmra.mrb[0].mxu1 %v339_v56 }
  0x7e   : > { %493 = vmatprep.mubr.f32.mxu0 %v330_v57  ;;  %529 = vmatprep.mubr.f32.mxu1 %v342_v58 }
  0x80   : > { %839 = vperm.xlu0 %1206, %v809_v19   ;;  %844 = vperm.xlu1 %1207, %v810_v20  }
  0x81   : > { %494 = vmatmul.mubr.f32.gmra.mrb[2].mxu0 %v329_v61  ;;  %530 = vmatmul.mubr.f32.gmra.mrb[2].mxu1 %v341_v62 }
  0x82   : > { %499 = vmatprep.mubr.f32.mxu0 %v332_v63  ;;  %535 = vmatprep.mubr.f32.mxu1 %v344_v0 }
  0x84   : > { %849 = vperm.xlu0 %1206, %v811_v23   ;;  %854 = vperm.xlu1 %1207, %v812_v24  }
  0x85   : > { %500 = vmatmul.mubr.f32.gmra.mrb[4].mxu0 %v331_v3  ;;  %536 = vmatmul.mubr.f32.gmra.mrb[4].mxu1 %v343_v4 }
  0x86   : > { %505 = vmatprep.mubr.f32.mxu0 %v334_v5  ;;  %541 = vmatprep.mubr.f32.mxu1 %v346_v6 }
  0x88   : > { %859 = vperm.xlu0 %1206, %v813_v25   ;;  %864 = vperm.xlu1 %1207, %v814_v26  }
  0x89   : > { %506 = vmatmul.mubr.f32.gmra.mrb[6].mxu0 %v333_v9  ;;  %542 = vmatmul.mubr.f32.gmra.mrb[6].mxu1 %v345_v10 }
  0x8a   : > { %511 = vmatprep.mubr.f32.mxu0 %v336_v11  ;;  %547 = vmatprep.mubr.f32.mxu1 %v348_v12 }
  0x8c   : > { %869 = vperm.xlu0 %1206, %v815_v27   ;;  %874 = vperm.xlu1 %1207, %v816_v28  }
  0x8d   : > { %512 = vmatmul.mubr.f32.gmra.mrb[8].mxu0 %v335_v15  ;;  %548 = vmatmul.mubr.f32.gmra.mrb[8].mxu1 %v347_v16 }
  0x8e   : > { %517 = vmatprep.mubr.f32.mxu0 %v338_v17  ;;  %553 = vmatprep.mubr.f32.mxu1 %v350_v18 }
  0x91   : > { %518 = vmatmul.mubr.f32.gmra.mrb[10].mxu0 %v337_v21  ;;  %554 = vmatmul.mubr.f32.gmra.mrb[10].mxu1 %v349_v22 }
  0xc7   : > { %v366_v29 = vpop.permute.xlu0 %365  ;;  %v376_v30 = vpop.permute.xlu1 %375 }
  0xcb   : > { %v371_v35 = vpop.permute.xlu0 %370  ;;  %v381_v36 = vpop.permute.xlu1 %380 }
  0xcf   : > { %v386_v53 = vpop.permute.xlu0 %385  ;;  %v391_v54 = vpop.permute.xlu1 %390 }
  0xd3   : > { %v396_v6 = vpop.permute.xlu0 %395  ;;  %v401_v8 = vpop.permute.xlu1 %400 }
  0xd7   : > { %v406_v19 = vpop.permute.xlu0 %405  ;;  %v411_v24 = vpop.permute.xlu1 %410 }
 0x150   : > { %v489_v31 = vpop.f32.mrb[0].mxu0  ;;  %v525_v32 = vpop.f32.mrb[0].mxu1 }
 0x151   : > { %v491_v33 = vpop.f32.mrb[1].mxu0  ;;  %v527_v34 = vpop.f32.mrb[1].mxu1  ;;  %v1729_v39 = vadd.f32 %v489_v31, %v366_v29  ;;  %v526_v17 = vadd.f32 %v525_v32, %v396_v6 }
 0x152   : > { %v1733_v43 = vadd.f32 %v491_v33, %v366_v29  ;;  %v1761_v20 = vadd.f32 %v527_v34, %v396_v6  ;;  %v416_v33 = vpop.permute.xlu0 %415 }
 0x154   : > { %v495_v37 = vpop.f32.mrb[2].mxu0  ;;  %v531_v38 = vpop.f32.mrb[2].mxu1 }
 0x155   : > { %v1731_v40 = vadd.f32 %v495_v37, %v371_v35  ;;  %v497_v41 = vpop.f32.mrb[3].mxu0  ;;  %v533_v42 = vpop.f32.mrb[3].mxu1  ;;  %v532_v22 = vadd.f32 %v531_v38, %v401_v8 }
 0x156   : > { %v1735_v44 = vadd.f32 %v497_v41, %v371_v35  ;;  %v1764_v25 = vadd.f32 %v533_v42, %v401_v8  ;;  %v421_v38 = vpop.permute.xlu1 %420 }
 0x157   : > { %v560_v45 = vadd.f32 %v1731_v40, %v1729_v39 }
 0x158   : > { %v577_v46 = vadd.f32 %v1735_v44, %v1733_v43  ;;  %v501_v47 = vpop.f32.mrb[4].mxu0  ;;  %v537_v48 = vpop.f32.mrb[4].mxu1 }
 0x159   : > { %v1741_v49 = vadd.f32 %v501_v47, %v376_v30  ;;  %v503_v50 = vpop.f32.mrb[5].mxu0  ;;  %v539_v51 = vpop.f32.mrb[5].mxu1  ;;  %v538_v27 = vadd.f32 %v537_v48, %v406_v19 }
 0x15a   : > { %v1743_v52 = vadd.f32 %v503_v50, %v376_v30  ;;  %v1767_v29 = vadd.f32 %v539_v51, %v406_v19 }
 0x15b   : > { %v561_v55 = vadd.f32 %v560_v45, %v1741_v49 }
 0x15c   : > { %v578_v56 = vadd.f32 %v577_v46, %v1743_v52  ;;  %v507_v57 = vpop.f32.mrb[6].mxu0  ;;  %v543_v58 = vpop.f32.mrb[6].mxu1 }
 0x15d   : > { %v1747_v59 = vadd.f32 %v507_v57, %v381_v36  ;;  %v509_v60 = vpop.f32.mrb[7].mxu0  ;;  %v545_v61 = vpop.f32.mrb[7].mxu1  ;;  %v544_v31 = vadd.f32 %v543_v58, %v411_v24 }
 0x15e   : > { %v1749_v62 = vadd.f32 %v509_v60, %v381_v36  ;;  %v546_v34 = vadd.f32 %v545_v61, %v411_v24 }
 0x15f   : > { %v562_v63 = vadd.f32 %v561_v55, %v1747_v59 }
 0x160   : > { %v579_v0 = vadd.f32 %v578_v56, %v1749_v62  ;;  %v513_v1 = vpop.f32.mrb[8].mxu0  ;;  %v549_v2 = vpop.f32.mrb[8].mxu1 }
 0x161   : > { %v1753_v3 = vadd.f32 %v513_v1, %v386_v53  ;;  %v515_v4 = vpop.f32.mrb[9].mxu0  ;;  %v551_v5 = vpop.f32.mrb[9].mxu1  ;;  %v550_v36 = vadd.f32 %v549_v2, %v416_v33 }
 0x162   : > { %v1755_v7 = vadd.f32 %v515_v4, %v386_v53  ;;  %v552_v41 = vadd.f32 %v551_v5, %v416_v33  ;;  %v1771_v1 = vpop.permute.xlu0 %723  ;;  %v1773_v2 = vpop.permute.xlu1 %728 }
 0x163   : > { %v563_v9 = vadd.f32 %v562_v63, %v1753_v3 }
 0x164   : > { %v580_v10 = vadd.f32 %v579_v0, %v1755_v7  ;;  %v519_v11 = vpop.f32.mrb[10].mxu0  ;;  %v555_v12 = vpop.f32.mrb[10].mxu1 }
 0x165   : > { %v520_v13 = vadd.f32 %v519_v11, %v391_v54  ;;  %v521_v14 = vpop.f32.mrb[11].mxu0  ;;  %v557_v15 = vpop.f32.mrb[11].mxu1  ;;  %v556_v45 = vadd.f32 %v555_v12, %v421_v38 }
 0x166   : > { %v1759_v16 = vadd.f32 %v521_v14, %v391_v54  ;;  %v558_v47 = vadd.f32 %v557_v15, %v421_v38 }
 0x167   : > { %v564_v18 = vadd.f32 %v563_v9, %v520_v13 }
 0x168   : > { %v581_v21 = vadd.f32 %v580_v10, %v1759_v16 }
 0x169   : > { %v565_v23 = vadd.f32 %v564_v18, %v526_v17 }
 0x16a   : > { %v582_v26 = vadd.f32 %v581_v21, %v1761_v20  ;;  %v1798_v21 = vpop.permute.xlu1 %738 }
 0x16b   : > { %v566_v28 = vadd.f32 %v565_v23, %v532_v22 }
 0x16c   : > { %v583_v30 = vadd.f32 %v582_v26, %v1764_v25 }
 0x16d   : > { %v567_v32 = vadd.f32 %v566_v28, %v538_v27 }
 0x16e   : > { %v584_v35 = vadd.f32 %v583_v30, %v1767_v29 }
 0x16f   : > { %v568_v37 = vadd.f32 %v567_v32, %v544_v31 }
 0x170   : > { %v585_v42 = vadd.f32 %v584_v35, %v546_v34  ;;  %v1839_v35 = vpop.permute.xlu1 %748 }
 0x171   : > { %v569_v46 = vadd.f32 %v568_v37, %v550_v36 }
 0x172   : > { %v586_v48 = vadd.f32 %v585_v42, %v552_v41 }
 0x173   : > { %v570_v50 = vadd.f32 %v569_v46, %v556_v45 }
 0x174   : > { %v587_v51 = vadd.f32 %v586_v48, %v558_v47  ;;  %v1865_v46 = vpop.permute.xlu1 %758 }
 0x175   : > { %v571_v53 = vrot.slane %v570_v50, 4 }
 0x176   : > { %v588_v54 = vrot.slane %v587_v51, 4 }
 0x177   : > { %v572_v55 = vadd.f32 %v571_v53, %v570_v50 }
 0x178   : > { %v589_v56 = vadd.f32 %v588_v54, %v587_v51 }
 0x179   : > { %v573_v57 = vrot.slane %v572_v55, 2 }
 0x17a   : > { %v590_v58 = vrot.slane %v589_v56, 2 }
 0x17b   : > { %v574_v60 = vadd.f32 %v573_v57, %v572_v55 }
 0x17c   : > { %v591_v61 = vadd.f32 %v590_v58, %v589_v56 }
 0x17d   : > { %v575_v63 = vrot.slane %v574_v60, 1 }
 0x17e   : > { %v592_v0 = vrot.slane %v591_v61, 1 }
 0x17f   : > { %v576_v4 = vadd.f32 %v575_v63, %v574_v60 }
 0x180   : > { %v593_v5 = vadd.f32 %v592_v0, %v591_v61  ;;  %v1881_v0 = vpop.permute.xlu1 %768 }
 0x181   : > { %v595_v6 = vmul.f32 0.010416667, %v576_v4 }
 0x182   : > { %v596_v8 = vmul.f32 0.010416667, %v593_v5 }
 0x183   : > { %v1776_v9 = vsub.f32 %v1729_v39, %v595_v6  ;;  %v1779_v10 = vsub.f32 %v1731_v40, %v595_v6  ;;  %v1782_v11 = vsub.f32 %v1741_v49, %v595_v6  ;;  %v1785_v12 = vsub.f32 %v1747_v59, %v595_v6  ;;  %v1796_v39 = vpop.permute.xlu0 %733 }
 0x184   : > { %v1788_v14 = vsub.f32 %v1753_v3, %v595_v6  ;;  %v1790_v15 = vsub.f32 %v520_v13, %v595_v6  ;;  %v1792_v18 = vsub.f32 %v526_v17, %v595_v6  ;;  %v1794_v19 = vsub.f32 %v532_v22, %v595_v6 }
 0x185   : > { %v1800_v40 = vsub.f32 %v538_v27, %v595_v6  ;;  %v1802_v49 = vsub.f32 %v544_v31, %v595_v6  ;;  %v1804_v23 = vsub.f32 %v550_v36, %v595_v6  ;;  %v1806_v59 = vsub.f32 %v556_v45, %v595_v6 }
 0x186   : > { %v621_v3 = vmul.f32 %v1776_v9, %v1776_v9  ;;  %v623_v13 = vmul.f32 %v1779_v10, %v1779_v10  ;;  %v625_v17 = vmul.f32 %v1782_v11, %v1782_v11  ;;  %v627_v22 = vmul.f32 %v1785_v12, %v1785_v12 }
 0x187   : > { %v1817_v26 = vsub.f32 %v1733_v43, %v596_v8  ;;  %v1820_v27 = vsub.f32 %v1735_v44, %v596_v8  ;;  %v1823_v28 = vsub.f32 %v1743_v52, %v596_v8  ;;  %v1826_v30 = vsub.f32 %v1749_v62, %v596_v8  ;;  %v1837_v43 = vpop.permute.xlu0 %743 }
 0x188   : > { %v645_v24 = vadd.f32 %v623_v13, %v621_v3  ;;  %v1829_v31 = vsub.f32 %v1755_v7, %v596_v8  ;;  %v1832_v32 = vsub.f32 %v1759_v16, %v596_v8  ;;  %v1835_v33 = vsub.f32 %v1761_v20, %v596_v8 }
 0x189   : > { %v1842_v52 = vsub.f32 %v1764_v25, %v596_v8  ;;  %v1845_v62 = vsub.f32 %v1767_v29, %v596_v8  ;;  %v1847_v36 = vsub.f32 %v546_v34, %v596_v8  ;;  %v1849_v7 = vsub.f32 %v552_v41, %v596_v8 }
 0x18a   : > { %v646_v44 = vadd.f32 %v645_v24, %v625_v17  ;;  %v1851_v16 = vsub.f32 %v558_v47, %v596_v8  ;;  %v622_v20 = vmul.f32 %v1817_v26, %v1817_v26  ;;  %v624_v37 = vmul.f32 %v1820_v27, %v1820_v27 }
 0x18b   : > { %v629_v38 = vmul.f32 %v1788_v14, %v1788_v14  ;;  %v631_v29 = vmul.f32 %v1790_v15, %v1790_v15  ;;  %v626_v34 = vmul.f32 %v1823_v28, %v1823_v28  ;;  %v1863_v45 = vpop.permute.xlu0 %753  ;;  %v633_v47 = vmul.f32 %v1792_v18, %v1792_v18 }
 0x18c   : > { %v647_v25 = vadd.f32 %v646_v44, %v627_v22  ;;  %v662_v41 = vadd.f32 %v624_v37, %v622_v20  ;;  %v628_v50 = vmul.f32 %v1826_v30, %v1826_v30  ;;  %v635_v53 = vmul.f32 %v1794_v19, %v1794_v19 }
 0x18d   : > { %v630_v55 = vmul.f32 %v1829_v31, %v1829_v31  ;;  %v637_v57 = vmul.f32 %v1800_v40, %v1800_v40  ;;  %v632_v60 = vmul.f32 %v1832_v32, %v1832_v32  ;;  %v639_v4 = vmul.f32 %v1802_v49, %v1802_v49 }
 0x18e   : > { %v648_v42 = vadd.f32 %v647_v25, %v629_v38  ;;  %v663_v51 = vadd.f32 %v662_v41, %v626_v34  ;;  %v634_v6 = vmul.f32 %v1835_v33, %v1835_v33  ;;  %v641_v3 = vmul.f32 %v1804_v23, %v1804_v23  ;;  %v1897_v25 = vpop.permute.xlu1 %778 }
 0x18f   : > { %v1879_v63 = vpop.permute.xlu0 %763  ;;  %v636_v17 = vmul.f32 %v1842_v52, %v1842_v52  ;;  %v643_v24 = vmul.f32 %v1806_v59, %v1806_v59  ;;  %v638_v20 = vmul.f32 %v1845_v62, %v1845_v62 }
 0x190   : > { %v649_v48 = vadd.f32 %v648_v42, %v631_v29  ;;  %v664_v56 = vadd.f32 %v663_v51, %v628_v50  ;;  %v640_v42 = vmul.f32 %v1847_v36, %v1847_v36  ;;  %v644_v51 = vmul.f32 %v1851_v16, %v1851_v16 }
 0x192   : > { %v650_v54 = vadd.f32 %v649_v48, %v633_v47  ;;  %v665_v61 = vadd.f32 %v664_v56, %v630_v55  ;;  %v642_v47 = vmul.f32 %v1849_v7, %v1849_v7  ;;  %v1907_v55 = vpop.permute.xlu1 %824 }
 0x193   : > { %v1895_v38 = vpop.permute.xlu0 %773 }
 0x194   : > { %v651_v58 = vadd.f32 %v650_v54, %v635_v53  ;;  %v666_v8 = vadd.f32 %v665_v61, %v632_v60 }
 0x196   : > { %v652_v5 = vadd.f32 %v651_v58, %v637_v57  ;;  %v667_v22 = vadd.f32 %v666_v8, %v634_v6  ;;  %v1911_v6 = vpop.permute.xlu1 %834 }
 0x197   : > { %v1905_v54 = vpop.permute.xlu0 %819 }
 0x198   : > { %v653_v13 = vadd.f32 %v652_v5, %v639_v4  ;;  %v668_v37 = vadd.f32 %v667_v22, %v636_v17 }
 0x19a   : > { %v654_v44 = vadd.f32 %v653_v13, %v641_v3  ;;  %v669_v34 = vadd.f32 %v668_v37, %v638_v20  ;;  %v1915_v20 = vpop.permute.xlu1 %844 }
 0x19b   : > { %v1909_v5 = vpop.permute.xlu0 %829 }
 0x19c   : > { %v655_v29 = vadd.f32 %v654_v44, %v643_v24  ;;  %v670_v48 = vadd.f32 %v669_v34, %v640_v42 }
 0x19e   : > { %v656_v41 = vrot.slane %v655_v29, 4  ;;  %v671_v53 = vadd.f32 %v670_v48, %v642_v47 }
 0x19f   : > { %v1913_v44 = vpop.permute.xlu0 %839 }
 0x1a0   : > { %v657_v50 = vadd.f32 %v656_v41, %v655_v29  ;;  %v672_v57 = vadd.f32 %v671_v53, %v644_v51  ;;  %v1919_v41 = vpop.permute.xlu1 %854 }
 0x1a2   : > { %v658_v56 = vrot.slane %v657_v50, 2  ;;  %v673_v60 = vrot.slane %v672_v57, 4 }
 0x1a3   : > { %v1917_v34 = vpop.permute.xlu0 %849 }
 0x1a4   : > { %v659_v58 = vadd.f32 %v658_v56, %v657_v50  ;;  %v674_v4 = vadd.f32 %v673_v60, %v672_v57  ;;  %v1927_v57 = vpop.permute.xlu1 %864 }
 0x1a6   : > { %v660_v61 = vrot.slane %v659_v58, 1  ;;  %v675_v3 = vrot.slane %v674_v4, 2 }
 0x1a7   : > { %v1925_v56 = vpop.permute.xlu0 %859 }
 0x1a8   : > { %v661_v8 = vadd.f32 %v660_v61, %v659_v58  ;;  %v676_v17 = vadd.f32 %v675_v3, %v674_v4 }
 0x1aa   : > { %v679_v13 = vmul.f32 0.010416667, %v661_v8  ;;  %v677_v24 = vrot.slane %v676_v17, 1 }
 0x1ac   : > { %v681_v22 = vadd.f32 1e-05, %v679_v13  ;;  %v678_v37 = vadd.f32 %v677_v24, %v676_v17 }
 0x1ae   : > { %1208 = vrsqrt.f32 %v681_v22  ;;  %v680_v29 = vmul.f32 0.010416667, %v678_v37 }
 0x1b0   : > { %v682_v42 = vadd.f32 1e-05, %v680_v29 }
 0x1b2   : > { %1210 = vrsqrt.f32 %v682_v42 }
 0x1b8   : > { %v1209_v47 = vpop.eup %1208 }
 0x1b9   : > { %v685_v48 = vmul.f32 %v1209_v47, %v1776_v9  ;;  %v687_v50 = vmul.f32 %v1209_v47, %v1779_v10  ;;  %v689_v51 = vmul.f32 %v1209_v47, %v1782_v11  ;;  %v691_v53 = vmul.f32 %v1209_v47, %v1785_v12 }
 0x1ba   : > { %v693_v58 = vmul.f32 %v1209_v47, %v1788_v14  ;;  %v695_v60 = vmul.f32 %v1209_v47, %v1790_v15  ;;  %v697_v61 = vmul.f32 %v1209_v47, %v1792_v18  ;;  %v699_v4 = vmul.f32 %v1209_v47, %v1794_v19 }
 0x1bb   : > { %v701_v9 = vmul.f32 %v1209_v47, %v1800_v40  ;;  %v703_v10 = vmul.f32 %v1209_v47, %v1802_v49  ;;  %v705_v11 = vmul.f32 %v1209_v47, %v1804_v23  ;;  %v707_v12 = vmul.f32 %v1209_v47, %v1806_v59  ;;  %v870_v47 = vpop.permute.xlu0 %869 }
 0x1bc   : > { %v781_v8 = vmul.f32 %v1771_v1, %v685_v48  ;;  %v783_v3 = vmul.f32 %v1773_v2, %v687_v50  ;;  %v785_v14 = vmul.f32 %v1796_v39, %v689_v51  ;;  %v787_v15 = vmul.f32 %v1798_v21, %v691_v53  ;;  %v1211_v22 = vpop.eup %1210  ;;  %v875_v48 = vpop.permute.xlu1 %874 }
 0x1bd   : > { %v789_v18 = vmul.f32 %v1837_v43, %v693_v58  ;;  %v791_v19 = vmul.f32 %v1839_v35, %v695_v60  ;;  %v793_v40 = vmul.f32 %v1863_v45, %v697_v61  ;;  %v795_v49 = vmul.f32 %v1865_v46, %v699_v4 }
 0x1be   : > { %v797_v23 = vmul.f32 %v1879_v63, %v701_v9  ;;  %v799_v59 = vmul.f32 %v1881_v0, %v703_v10  ;;  %v801_v13 = vmul.f32 %v1895_v38, %v705_v11  ;;  %v803_v17 = vmul.f32 %v1897_v25, %v707_v12 }
 0x1bf   : > { %v877_v24 = vadd.f32 %v1905_v54, %v781_v8  ;;  %v879_v37 = vadd.f32 %v1907_v55, %v783_v3  ;;  %v881_v29 = vadd.f32 %v1909_v5, %v785_v14  ;;  %v883_v42 = vadd.f32 %v1911_v6, %v787_v15 }
 0x1c0   : > { %v885_v50 = vadd.f32 %v1913_v44, %v789_v18  ;;  %v887_v51 = vadd.f32 %v1915_v20, %v791_v19  ;;  %v889_v53 = vadd.f32 %v1917_v34, %v793_v40  ;;  %v891_v58 = vadd.f32 %v1919_v41, %v795_v49 }
 0x1c1   : > { %v893_v60 = vadd.f32 %v1925_v56, %v797_v23  ;;  %v895_v61 = vadd.f32 %v1927_v57, %v799_v59  ;;  %v897_v4 = vadd.f32 %v870_v47, %v801_v13  ;;  %v899_v9 = vadd.f32 %v875_v48, %v803_v17  ;;  %901 = vst [vmem:[%s1962_s28] sm:$0xff] %v877_v24 }
 0x1c2   : > { %903 = vst [vmem:[%s1962_s28 + $0x10] sm:$0xff] %v879_v37  ;;  %905 = vst [vmem:[%s1962_s28 + $0x20] sm:$0xff] %v881_v29  ;;  %v686_v10 = vmul.f32 %v1211_v22, %v1817_v26  ;;  %v688_v11 = vmul.f32 %v1211_v22, %v1820_v27  ;;  %v690_v12 = vmul.f32 %v1211_v22, %v1823_v28 }
 0x1c3   : > { %907 = vst [vmem:[%s1962_s28 + $0x30] sm:$0xff] %v883_v42  ;;  %909 = vst [vmem:[%s1962_s28 + $0x40] sm:$0xff] %v885_v50  ;;  %v692_v8 = vmul.f32 %v1211_v22, %v1826_v30  ;;  %v694_v3 = vmul.f32 %v1211_v22, %v1829_v31  ;;  %v696_v14 = vmul.f32 %v1211_v22, %v1832_v32 }
 0x1c4   : > { %911 = vst [vmem:[%s1962_s28 + $0x50] sm:$0xff] %v887_v51  ;;  %913 = vst [vmem:[%s1962_s28 + $0x60] sm:$0xff] %v889_v53  ;;  %v698_v15 = vmul.f32 %v1211_v22, %v1835_v33  ;;  %v700_v26 = vmul.f32 %v1211_v22, %v1842_v52  ;;  %v702_v27 = vmul.f32 %v1211_v22, %v1845_v62 }
 0x1c5   : > { %915 = vst [vmem:[%s1962_s28 + $0x70] sm:$0xff] %v891_v58  ;;  %917 = vst [vmem:[%s1962_s28 + $0x80] sm:$0xff] %v893_v60  ;;  %v704_v28 = vmul.f32 %v1211_v22, %v1847_v36  ;;  %v706_v30 = vmul.f32 %v1211_v22, %v1849_v7  ;;  %v708_v18 = vmul.f32 %v1211_v22, %v1851_v16 }
 0x1c6   : > { %919 = vst [vmem:[%s1962_s28 + $0x90] sm:$0xff] %v895_v61  ;;  %921 = vst [vmem:[%s1962_s28 + $0xa0] sm:$0xff] %v897_v4  ;;  %v782_v19 = vmul.f32 %v1771_v1, %v686_v10  ;;  %v784_v40 = vmul.f32 %v1773_v2, %v688_v11  ;;  %v786_v31 = vmul.f32 %v1796_v39, %v690_v12 }
 0x1c7   : > { %923 = vst [vmem:[%s1962_s28 + $0xb0] sm:$0xff] %v899_v9  ;;  %v788_v32 = vmul.f32 %v1798_v21, %v692_v8  ;;  %v790_v33 = vmul.f32 %v1837_v43, %v694_v3  ;;  %v792_v52 = vmul.f32 %v1839_v35, %v696_v14  ;;  %v794_v62 = vmul.f32 %v1863_v45, %v698_v15 }
 0x1c8   : > { %v796_v36 = vmul.f32 %v1865_v46, %v700_v26  ;;  %v798_v7 = vmul.f32 %v1879_v63, %v702_v27  ;;  %v800_v1 = vmul.f32 %v1881_v0, %v704_v28  ;;  %v802_v2 = vmul.f32 %v1895_v38, %v706_v30 }
 0x1c9   : > { %v804_v39 = vmul.f32 %v1897_v25, %v708_v18  ;;  %v878_v21 = vadd.f32 %v1905_v54, %v782_v19  ;;  %v880_v43 = vadd.f32 %v1907_v55, %v784_v40  ;;  %v882_v35 = vadd.f32 %v1909_v5, %v786_v31 }
 0x1ca   : > { %v884_v16 = vadd.f32 %v1911_v6, %v788_v32  ;;  %v886_v45 = vadd.f32 %v1913_v44, %v790_v33  ;;  %v888_v46 = vadd.f32 %v1915_v20, %v792_v52  ;;  %v890_v63 = vadd.f32 %v1917_v34, %v794_v62 }
 0x1cb   : > { %v892_v0 = vadd.f32 %v1919_v41, %v796_v36  ;;  %v894_v38 = vadd.f32 %v1925_v56, %v798_v7  ;;  %v896_v25 = vadd.f32 %v1927_v57, %v800_v1  ;;  %v898_v54 = vadd.f32 %v870_v47, %v802_v2  ;;  %902 = vst [vmem:[%s1962_s28 + $0x8] sm:$0xff] %v878_v21 }
 0x1cc   : > { %v900_v55 = vadd.f32 %v875_v48, %v804_v39  ;;  %904 = vst [vmem:[%s1962_s28 + $0x18] sm:$0xff] %v880_v43  ;;  %906 = vst [vmem:[%s1962_s28 + $0x28] sm:$0xff] %v882_v35 }
 0x1cd   : > { %908 = vst [vmem:[%s1962_s28 + $0x38] sm:$0xff] %v884_v16  ;;  %910 = vst [vmem:[%s1962_s28 + $0x48] sm:$0xff] %v886_v45 }
 0x1ce   : > { %912 = vst [vmem:[%s1962_s28 + $0x58] sm:$0xff] %v888_v46  ;;  %914 = vst [vmem:[%s1962_s28 + $0x68] sm:$0xff] %v890_v63 }
 0x1cf   : > { %916 = vst [vmem:[%s1962_s28 + $0x78] sm:$0xff] %v892_v0  ;;  %918 = vst [vmem:[%s1962_s28 + $0x88] sm:$0xff] %v894_v38 }
 0x1d0   : > { %920 = vst [vmem:[%s1962_s28 + $0x98] sm:$0xff] %v896_v25  ;;  %922 = vst [vmem:[%s1962_s28 + $0xa8] sm:$0xff] %v898_v54 }
 0x1d1   : > { %924 = vst [vmem:[%s1962_s28 + $0xb8] sm:$0xff] %v900_v55 }
 0x1d2   : > { %1255 = shalt.err (!%p1252_p5)
}
 0x1d3   : > { %s1256_s13 = scalar_lea.hbm %s2013_s16, 3072  ;;  %s1260_s27 = scalar_lea.hbm %s2083_s5, 6144 }
 0x1d4   : > { %p1257_p4 = scmp.ne.s32.totalorder %s2013_s16, %s1256_s13  ;;  %p1261_p12 = scmp.lt.u32.totalorder %s2013_s16, %s2083_s5 }
 0x1d5   : > { %p1262_p1 = scmp.lt.u32.totalorder %s1260_s27, %s1256_s13  ;;  %p1264_p8 = scmp.lt.u32.totalorder %s1256_s13, %s2013_s16 }
 0x1d6   : > { %p1258_p7 = pnand %p1257_p4, %p2091_p9 }
 0x1d7   : > { %p1263_p3 = por %p1262_p1, %p1261_p12 }
 0x1d8   : > { %p1259_p10 = pneg %p1258_p7 }
 0x1d9   : > { %p1265_p11 = por %p1264_p8, %p1263_p3 }
 0x1db   : > { %p1266_p0 = pnand %p1265_p11, %p1259_p10 }
 0x1dd   : > { %1269 = shalt.err (!%p1266_p0)
}
 0x1de   : > { %s1331_s21 = smov 256   ;;  %s1332_s14 = smov 16  }
 0x1df   : > { %1141 = dma.vmem_to_hbm [thread:$0]  (%p2091_p9), %s2015_s30, 3072, %s2013_s16, %s926_s11, %s1331_s21, %s1331_s21, %s1332_s14  }
 0x1e0 PF: > { %s956_s17 = sand.u32 1, %s1304_s18   ;;  %p2092_p6 = scmp.ne.s32.totalorder %s2088_s8, 0 }
 0x1e1   : > { %p2093_p13 = scmp.ge.s32.totalorder %s1324_s23, 2  ;;  %s957_s24 = scalar_lea.sflag [#allocation4], %s956_s17 }
 0x1e3   : > { %p1148_p2 = pnand %p2093_p13, %p2092_p6 }
 0x1e5   : > { %1299 = dma.done.wait (!%p1148_p2), %s957_s24, 3072  }
 0x1e6   : > { %1301 = vsyncadd (!%p1148_p2), %s957_s24, 4294964224  ;;  %s21_s23 = sadd.s32 1, %s1324_s23   ;;  %s2094_s18 = smov %s1308_s19 }
 0x1e7   : > { %p18_p5 = scmp.ge.s32.totalorder %s21_s23, 4   ;;  %s2095_s19 = smov %s1312_s20 }
 0x1e8   : > { %s2096_s20 = smov %s1419_s7  ;;  %s2097_s21 = smov %s1320_s22 }
 0x1e9   : > { %s2098_s22 = smov %s2100_s26  ;;  %20 = sbr.rel (!%p18_p5) target bundleno = 6 (0x6), region = 85 }
 0x1f0   :  { %962 = vsyncpa [#allocation3], 1 }
 0x1f1   :  { %964 = vsyncpa [#allocation3 + $0x1], 1 }
 0x1f2   :  { %965 = vsyncpa [#allocation4], 1 }
 0x1f3   :  { %967 = vsyncpa [#allocation4 + $0x1], 1 }

</bundles_post_ra>
